<compile_context>
chip_gen: v6e
topology: v6e:2x2x1
jax: 0.10.0
libtpu: 0.0.40
codegen_flags: <defaults>
</compile_context>

<pallas_src>
import math
from functools import partial

import jax
import jax.numpy as jnp
from jax.experimental import pallas as pl
from jax.experimental.pallas import tpu as pltpu

EPS = 1e-6


def _round_up(x, m):
    return ((x + m - 1) // m) * m


def _tpu_generation_params():
    """(dma_budget_bytes, vmem_limit_bytes, num_tensorcore_hint) per chip gen.

    Heuristic: v7x exposes 64 MiB VMEM per TensorCore (2 TCs/chip), v5e/v6e
    expose 128 MiB (single TC).  On query failure fall back to the tightest
    (v7x-safe) budget so we never over-allocate.
    """
    try:
        vmem_cap = int(pltpu.get_tpu_info().vmem_capacity_bytes)
    except Exception:
        vmem_cap = 64 * 1024 * 1024
    if vmem_cap <= 64 * 1024 * 1024:
        # v7x: large DMAs hide the ~0.35us/step overhead against 3.2 TB/s HBM,
        # but total scoped VMEM must stay well under the 64 MiB physical cap.
        return 16 * 1024 * 1024, 44 * 1024 * 1024, 2
    # v5e / v6e: 128 MiB physical VMEM, single TensorCore -> bigger blocks,
    # fewer grid steps, better-hidden DMAs.
    return 20 * 1024 * 1024, 64 * 1024 * 1024, 1


_DMA_BUDGET, _VMEM_LIMIT_BYTES, _NUM_TC_HINT = _tpu_generation_params()


def _choose_tile_rows(n_rows, d, dtype, n_io, f32_temps):
    """Largest row tile whose pipeline buffers + f32 temporaries fit the budget."""
    itemsize = jnp.dtype(dtype).itemsize
    # packed sublane granularity: 8 rows (f32), 16 (bf16), 32 (int8 / fp8)
    sub = max(8, 32 // itemsize)
    # 2 pipeline (double) buffers per in/out array + in-kernel f32 temporaries
    bytes_per_row = (2 * n_io * itemsize + 4 * f32_temps) * d
    tile = _DMA_BUDGET // max(bytes_per_row, 1)
    tile = max(sub, (int(tile) // sub) * sub)
    # never bigger than the (sublane-rounded) problem size
    tile = min(tile, _round_up(n_rows, sub))
    # 2-TC chips (v7x) only: keep >= 2 grid steps so the "parallel" axis can
    # shard across both TensorCores.  On single-TC v5e/v6e the grid is a
    # serial loop, so a problem that fits one block stays one block.
    if _NUM_TC_HINT >= 2 and n_rows > sub and tile >= n_rows:
        tile = _round_up(pl.cdiv(n_rows, 2), sub)
    return max(tile, sub)


# ---------------------------------------------------------------------------
# Normalizator:  alpha * (x - mean) / (std + eps) + gamma   (std unbiased, ddof=1)
# ---------------------------------------------------------------------------
def _normalizator_kernel(ag_ref, x_ref, o_ref):
    """One (tile_rows, d) block; ag_ref is the SMEM scalar-prefetch [alpha, gamma]."""
    x = x_ref[...].astype(jnp.float32)
    d = x.shape[-1]
    mean = jnp.mean(x, axis=-1, keepdims=True)
    diff = x - mean
    # torch.std default: unbiased estimator (divide by d-1)
    var = jnp.sum(diff * diff, axis=-1, keepdims=True) * jnp.float32(1.0 / (d - 1))
    std = jnp.sqrt(var)
    # EPS added to std (not variance) to match the PyTorch Normalizator.
    # EXACT per-row scale: the divide acts on a (tile_rows, 1) column --
    # d_model-times fewer ops than the elementwise work and fully hidden
    # under the DMA, and it removes the approx-reciprocal systematic error.
    scale = ag_ref[0] / (std + jnp.float32(EPS))
    o_ref[...] = (diff * scale + ag_ref[1]).astype(o_ref.dtype)


def normalizator(x, alpha, gamma, *, tile_rows=None):
    """Applies Normalizator over the last dim of x (any leading dims)."""
    orig_shape = x.shape
    d = orig_shape[-1]
    if d < 2:
        raise ValueError("Normalizator needs d_model >= 2 (unbiased std divides by d-1).")
    x2 = x.reshape(-1, d)
    n_rows = x2.shape[0]
    if tile_rows is None:
        # 2 I/O streams (x in, out) + ~3 f32 block temporaries in-kernel
        tile_rows = _choose_tile_rows(n_rows, d, x2.dtype, n_io=2, f32_temps=3)
    grid = (pl.cdiv(n_rows, tile_rows),)              # ragged tail masked by Pallas

    ag = jnp.stack(
        [jnp.asarray(alpha).reshape(()), jnp.asarray(gamma).reshape(())]
    ).astype(jnp.float32)

    itemsize = jnp.dtype(x2.dtype).itemsize
    cost = pl.CostEstimate(
        flops=7 * n_rows * d,
        transcendentals=2 * n_rows,                   # sqrt + divide per row
        bytes_accessed=2 * n_rows * d * itemsize,
    )

    out = pl.pallas_call(
        _normalizator_kernel,
        out_shape=jax.ShapeDtypeStruct((n_rows, d), x2.dtype),
        grid_spec=pltpu.PrefetchScalarGridSpec(
            num_scalar_prefetch=1,
            grid=grid,
            in_specs=[pl.BlockSpec((tile_rows, d), lambda i, ag: (i, 0))],
            out_specs=pl.BlockSpec((tile_rows, d), lambda i, ag: (i, 0)),
        ),
        compiler_params=pltpu.CompilerParams(
            dimension_semantics=("parallel",),
            vmem_limit_bytes=_VMEM_LIMIT_BYTES,
        ),
        cost_estimate=cost,
    )(ag, x2)
    return out.reshape(orig_shape)


# ---------------------------------------------------------------------------
# Training-mode fused residual + dropout:  out = x + dropout(y)
# (eval mode uses plain JAX `x + y` so XLA fuses the add into `layer`)
# ---------------------------------------------------------------------------
def _residual_dropout_kernel(seed_ref, x_ref, y_ref, o_ref, *, keep_prob):
    # Per-block reseed so every grid step draws independent bits.
    pltpu.prng_seed(seed_ref[0] + pl.program_id(0))
    bits = pltpu.bitcast(pltpu.prng_random_bits(x_ref.shape), jnp.uint32)
    thresh = jnp.uint32(min(int(round(keep_prob * float(2 ** 32))), 2 ** 32 - 1))
    keep = bits < thresh
    # dtype casts happen in-kernel (free VPU work hidden under DMA); add in f32.
    x = x_ref[...].astype(jnp.float32)
    y = y_ref[...].astype(jnp.float32)
    dropped = jnp.where(keep, y * jnp.float32(1.0 / keep_prob), jnp.float32(0.0))
    o_ref[...] = (x + dropped).astype(o_ref.dtype)


def residual_dropout_add(x, y, rate, rng, *, tile_rows=None):
    """out = x + dropout(y, rate) with the mask generated and applied in-kernel."""
    orig_shape = x.shape
    d = orig_shape[-1]
    out_dtype = jnp.result_type(x.dtype, y.dtype)
    x2 = x.reshape(-1, d)
    y2 = y.reshape(-1, d)
    n_rows = x2.shape[0]
    if tile_rows is None:
        # 3 I/O streams (x, y, out) + ~4 f32/u32 block temporaries in-kernel
        tile_rows = _choose_tile_rows(n_rows, d, out_dtype, n_io=3, f32_temps=4)
    grid = (pl.cdiv(n_rows, tile_rows),)
    seed = jax.random.randint(rng, (1,), 0, jnp.iinfo(jnp.int32).max, jnp.int32)
    keep_prob = 1.0 - float(rate)
    itemsize = jnp.dtype(out_dtype).itemsize
    cost = pl.CostEstimate(
        flops=3 * n_rows * d,
        transcendentals=0,
        bytes_accessed=3 * n_rows * d * itemsize,
    )
    out = pl.pallas_call(
        partial(_residual_dropout_kernel, keep_prob=keep_prob),
        out_shape=jax.ShapeDtypeStruct((n_rows, d), out_dtype),
        grid_spec=pltpu.PrefetchScalarGridSpec(
            num_scalar_prefetch=1,
            grid=grid,
            in_specs=[pl.BlockSpec((tile_rows, d), lambda i, s: (i, 0)),
                      pl.BlockSpec((tile_rows, d), lambda i, s: (i, 0))],
            out_specs=pl.BlockSpec((tile_rows, d), lambda i, s: (i, 0)),
        ),
        compiler_params=pltpu.CompilerParams(
            dimension_semantics=("parallel",),
            vmem_limit_bytes=_VMEM_LIMIT_BYTES,
        ),
        cost_estimate=cost,
    )(seed, x2, y2)
    return out.reshape(orig_shape)


# ---------------------------------------------------------------------------
# Module mirror
# ---------------------------------------------------------------------------
class ResidualConnector:
    """JAX mirror of models/GTN2.py::ResidualConnector.

    forward(input, layer) = input + dropout(layer(Normalizator(input)))
    `layer` is a plain callable (an external sub-module in the original code).
    """

    def __init__(self, dropout: float):
        self.dropout_rate = float(dropout)
        # Normalizator parameters: alpha = ones(1), gamma = zeros(1)
        self.alpha = jnp.ones((1,), jnp.float32)
        self.gamma = jnp.zeros((1,), jnp.float32)

    def __call__(self, x, layer, *, training=False, rng=None):
        normed = normalizator(x, self.alpha, self.gamma)
        layer_out = layer(normed)
        if training and self.dropout_rate > 0.0:
            if rng is None:
                raise ValueError("training=True with dropout > 0 requires an rng key")
            # Fused Pallas residual + dropout: no mask / rescaled copy in HBM.
            return residual_dropout_add(x, layer_out, self.dropout_rate, rng)
        # Eval mode: dropout is identity.  Plain-JAX add lets XLA fuse the
        # residual into `layer`'s output epilogue, saving one full HBM
        # write+read of layer_out vs. an opaque pallas_call.
        return x + layer_out


# ---------------------------------------------------------------------------
# Self-check (eval-mode forward against a pure-JAX reference)
# ---------------------------------------------------------------------------
def _reference_forward(x, w, alpha, gamma):
    mean = jnp.mean(x, axis=-1, keepdims=True)
    d = x.shape[-1]
    var = jnp.sum((x - mean) ** 2, axis=-1, keepdims=True) / (d - 1)
    std = jnp.sqrt(var)
    normed = alpha * (x - mean) / (std + EPS) + gamma
    return x + normed @ w                     # eval-mode dropout == identity


if __name__ == "__main__":
    key = jax.random.PRNGKey(0)
    kx, kw = jax.random.split(key)
    batch, seq, d_model = 2, 8, 128           # d_model multiple of 128 -> lane-dense stores
    x = jax.random.normal(kx, (batch, seq, d_model), dtype=jnp.float32)
    w = jax.random.normal(kw, (d_model, d_model), dtype=jnp.float32) / math.sqrt(d_model)

    layer = lambda h: h @ w                   # external sub-layer stand-in
    block = ResidualConnector(dropout=0.1)

    out = jax.block_until_ready(block(x, layer))   # eval-mode forward

    ref = _reference_forward(x, w, jnp.float32(1.0), jnp.float32(0.0))
    assert out.shape == x.shape
    assert jnp.allclose(out, ref, atol=1e-4, rtol=1e-4), float(jnp.max(jnp.abs(out - ref)))

    print("KERNEL_OK")
</pallas_src>

<mosaic_0001>
module attributes {stable_mosaic.version = 11 : i64} {
  func.func @_normalizator_kernel(%arg0: i32, %arg1: memref<2xf32, #tpu.memory_space<smem>>, %arg2: memref<8x128xf32, #tpu.memory_space<vmem>>, %arg3: memref<8x128xf32, #tpu.memory_space<vmem>>) attributes {dimension_semantics = [#tpu.dimension_semantics<parallel>], iteration_bounds = array<i64: 2>, scalar_prefetch = 1 : i64, scratch_operands = 0 : i64, tpu.core_type = #tpu.core_type<tc>, window_params = [{transform_indices = @transform_0, window_bounds = array<i64: 8, 128>}, {transform_indices = @transform_1, window_bounds = array<i64: 8, 128>}]} {
    %c0 = arith.constant 0 : index
    %c0_0 = arith.constant 0 : index
    %0 = vector.load %arg2[%c0, %c0_0] : memref<8x128xf32, #tpu.memory_space<vmem>>, vector<8x128xf32>
    %cst = arith.constant dense<0.000000e+00> : vector<8xf32>
    %1 = vector.multi_reduction <add>, %0, %cst [1] : vector<8x128xf32> to vector<8xf32>
    %2 = vector.shape_cast %1 : vector<8xf32> to vector<8x1xf32>
    %cst_1 = arith.constant 1.280000e+02 : f32
    %3 = vector.broadcast %cst_1 : f32 to vector<8x1xf32>
    %4 = arith.divf %2, %3 : vector<8x1xf32>
    %5 = vector.broadcast %4 : vector<8x1xf32> to vector<8x128xf32>
    %6 = arith.subf %0, %5 : vector<8x128xf32>
    %7 = arith.mulf %6, %6 : vector<8x128xf32>
    %cst_2 = arith.constant dense<0.000000e+00> : vector<8xf32>
    %8 = vector.multi_reduction <add>, %7, %cst_2 [1] : vector<8x128xf32> to vector<8xf32>
    %9 = vector.shape_cast %8 : vector<8xf32> to vector<8x1xf32>
    %cst_3 = arith.constant 0.00787401571 : f32
    %10 = vector.broadcast %cst_3 : f32 to vector<8x1xf32>
    %11 = arith.mulf %9, %10 : vector<8x1xf32>
    %12 = math.sqrt %11 : vector<8x1xf32>
    %c0_4 = arith.constant 0 : index
    %13 = memref.load %arg1[%c0_4] : memref<2xf32, #tpu.memory_space<smem>>
    %cst_5 = arith.constant 9.99999997E-7 : f32
    %14 = vector.broadcast %cst_5 : f32 to vector<8x1xf32>
    %15 = arith.addf %12, %14 : vector<8x1xf32>
    %16 = vector.broadcast %13 : f32 to vector<8x1xf32>
    %17 = arith.divf %16, %15 : vector<8x1xf32>
    %18 = vector.broadcast %17 : vector<8x1xf32> to vector<8x128xf32>
    %19 = arith.mulf %6, %18 : vector<8x128xf32>
    %c1 = arith.constant 1 : index
    %20 = memref.load %arg1[%c1] : memref<2xf32, #tpu.memory_space<smem>>
    %21 = vector.broadcast %20 : f32 to vector<8x128xf32>
    %22 = arith.addf %19, %21 : vector<8x128xf32>
    %c0_6 = arith.constant 0 : index
    %c0_7 = arith.constant 0 : index
    %23 = vector.load %arg3[%c0_6, %c0_7] : memref<8x128xf32, #tpu.memory_space<vmem>>, vector<8x128xf32>
    tpu.vector_store %arg3[%c0_6, %c0_7], %22 {strides = array<i32>} : memref<8x128xf32, #tpu.memory_space<vmem>>, vector<8x128xf32>,
    return
  }
  func.func @transform_0(%arg0: i32, %arg1: memref<2xf32, #tpu.memory_space<smem>>) -> (i32, i32) {
    %c0_i32 = arith.constant 0 : i32
    %c0_i32_0 = arith.constant 0 : i32
    return %arg0, %c0_i32 : i32, i32
  }
  func.func @transform_1(%arg0: i32, %arg1: memref<2xf32, #tpu.memory_space<smem>>) -> (i32, i32) {
    %c0_i32 = arith.constant 0 : i32
    %c0_i32_0 = arith.constant 0 : i32
    return %arg0, %c0_i32 : i32, i32
  }
}

</mosaic_0001>

<bundles_post_ra>
// kernel: tpu_custom_call.1
= control target key start
LH: loop header
LB: loop body
LE: loop exit
PB: predicated region body
PF: predicated region fallthrough
CT: control target
= control target key end

     0   :  { %s416_s9 = smov [#allocation3]   ;;  %s582_s0 = inlined_call_operand.hbm [shape: f32[2], index: 0, kind: input, shape index: {}]   ;;  %s583_s1 = inlined_call_operand.hbm [shape: f32[16,128], index: 1, kind: input, shape index: {}]   ;;  %s584_s2 = inlined_call_operand.hbm [shape: f32[16,128], index: 2, kind: output, shape index: {}]  }
   0x1   :  { %8 = dma.hbm_to_smem %s582_s0, 16, %s416_s9, [#allocation2] }
   0x2   :  { %390 = dma.done.wait [#allocation2], 16 }
   0x3   :  { %391 = vsyncadd [#allocation2], 4294967280 }
   0x4   :  { %10 = sfence }
   0x5   :  { %11 = vsyncpa [#allocation5], 0 }
   0x6   :  { %13 = vsyncpa [#allocation5 + $0x1], 0 }
   0x7   :  { %14 = vsyncpa [#allocation6], 0 }
   0x8   :  { %16 = vsyncpa [#allocation6 + $0x1], 0  ;;  %s437_s12 = smov 0   ;;  %s439_s13 = smov 0  }
   0x9   :  { %s441_s14 = smov 0   ;;  %s443_s15 = smov 0  }
   0xa LB: > { %s458_s0 = sadd.s32 4294967295, %s414_s15   ;;  %s248_s16 = sadd.s32 4294967294, %s414_s15   ;;  %s414_s15 = sphi %s443_s15, %s601_s15   ;;  %s410_s14 = sphi %s441_s14, %s600_s14   ;;  %s406_s13 = sphi %s439_s13, %s599_s13   ;;  %s402_s12 = sphi %s437_s12, %s598_s12  }
   0xb   : > { %s462_s17 = sadd.s32 1, %s414_s15   ;;  %s29_s18 = sadd.s32 1, %s410_s14 }
   0xc   : > { %s26_s19 = ssub.s32 %s414_s15, %s462_s17  ;;  %p36_p0 = scmp.ne.s32.totalorder %s410_s14, %s406_s13 }
   0xd   : > { %p27_p1 = scmp.eq.s32.totalorder %s26_s19, 0  ;;  %p37_p2 = scmp.eq.s32.totalorder %s414_s15, 0 }
   0xe   : > { %p42_p3 = scmp.ne.s32.totalorder %s406_s13, %s402_s12  ;;  %p43_p4 = scmp.eq.s32.totalorder %s458_s0, 0 }
   0xf   : > { %s474_s20 = scalar_select %p27_p1, %s410_s14, %s29_s18  }
  0x10   : > { %p476_p5 = por %p37_p2, %p36_p0  ;;  %p480_p6 = por %p43_p4, %p42_p3 }
  0x11   : > { %p66_p7 = scmp.eq.s32.totalorder %s458_s0, 1  ;;  %p72_p8 = scmp.eq.s32.totalorder %s248_s16, 1 }
  0x12   : > { %s588_s22 = scalar_select %p480_p6, 1, 0 }
  0x13   : > { %p273_p10 = scmp.lt.s32.totalorder %s414_s15, 2  ;;  %p487_p11 = por %p66_p7, %p36_p0 }
  0x14   : > { %p491_p12 = por %p72_p8, %p42_p3  ;;  %s92_s25 = sand.u32 1, %s410_s14  }
  0x15   : > { %s589_s23 = scalar_select %p487_p11, 1, 0 }
  0x16   : > { %s590_s24 = scalar_select %p491_p12, 1, 0 }
  0x17   : > { %s252_s26 = sshll.u32 %s414_s15, 7  ;;  %s251_s27 = sshll.u32 %s92_s25, 3 }
  0x18   : > { %s500_s30 = scalar_lea.hbm %s583_s1, %s252_s26  ;;  %s96_s3 = scalar_lea.vmem [#allocation4], %s251_s27 }
  0x19   : > { %s103_s4 = sshll.u32 %s96_s3, 4  ;;  %p504_p13 = pnand %p273_p10, %p476_p5  ;;  %s508_s4 = int_to_ptr.vmem [resolvable:$true] %s103_s4 }
  0x1a   : > { %s93_s6 = scalar_lea.sflag [#allocation5], %s92_s25  ;;  %s320_s7 = scalar_lea.hbm %s500_s30, 128 }
  0x1b   : > { %p321_p2 = scmp.ne.s32.totalorder %s500_s30, %s320_s7  ;;  %p322_p3 = pneg %p504_p13 }
  0x1c   : > { %s325_s10 = scalar_lea.hbm %s583_s1, 256  ;;  %p326_p5 = scmp.lt.s32.totalorder %s500_s30, %s583_s1 }
  0x1d   : > { %p323_p4 = pnand %p322_p3, %p321_p2  ;;  %p327_p8 = scmp.lt.s32.totalorder %s325_s10, %s320_s7 }
  0x1f   : > { %p324_p7 = pneg %p323_p4  ;;  %p328_p10 = por %p327_p8, %p326_p5 }
  0x21   : > { %p329_p9 = pnand %p328_p10, %p324_p7 }
  0x23   : > { %332 = shalt.err (!%p329_p9)
}
  0x24   : > { %s333_s18 = scalar_lea.vmem %s508_s4, 128  ;;  %s417_s19 = smov [#allocation4]  }
  0x25   : > { %p334_p0 = scmp.ne.s32.totalorder %s508_s4, %s333_s18  ;;  %s338_s21 = sshll.u32 %s417_s19, 4  ;;  %s339_s21 = int_to_ptr.vmem [resolvable:$false] %s338_s21 }
  0x26   : > { %s340_s25 = scalar_lea.vmem %s339_s21, 256  ;;  %p341_p4 = scmp.lt.s32.totalorder %s508_s4, %s339_s21 }
  0x27   : > { %p336_p1 = pnand %p334_p0, %p322_p3  ;;  %p342_p12 = scmp.lt.s32.totalorder %s340_s25, %s333_s18 }
  0x29   : > { %p337_p2 = pneg %p336_p1  ;;  %p343_p11 = por %p342_p12, %p341_p4 }
  0x2b   : > { %p344_p6 = pnand %p343_p11, %p337_p2 }
  0x2d   : > { %347 = shalt.err (!%p344_p6)
}
  0x2e   : > { %268 = dma.hbm_to_vmem [thread:$0]  (!%p504_p13), %s500_s30, 128, %s508_s4, %s93_s6  }
  0x2f   : > { %p592_p9 = scmp.lt.s32.totalorder %s414_s15, 3  ;;  %p593_p7 = scmp.ge.s32.totalorder %s414_s15, 1 }
  0x31   : > { %p109_p0 = pnand %p593_p7, %p592_p9 }
  0x32   : > { %s535_s26 = sand.u32 (!%p109_p0), 1, %s406_s13   ;;  %p594_p6 = scmp.ne.s32.totalorder (!%p109_p0), %s588_s22, 0 }
  0x33   : > { %112 = sbr.rel (%p109_p0) target bundleno = 395 (0x18b), region = 24  ;;  %s254_s27 = sshll.u32 (!%p109_p0), %s535_s26, 3 }
  0x34   : > { %s115_s28 = scalar_lea.sflag (!%p109_p0), [#allocation5], %s535_s26  ;;  %s118_s29 = scalar_lea.vmem (!%p109_p0), [#allocation4], %s254_s27 }
  0x38   : > { %393 = dma.done.wait (%p594_p6), %s115_s28, 128  }
  0x39   : > { %395 = vsyncadd (%p594_p6), %s115_s28, 4294967168  ;;  %v137_v0 = vld [vmem:[%s118_s29] sm:$0xff]  ;;  %s154_s22 = sld [smem:[#allocation3]]  ;;  %s258_s3 = sshll.u32 %s458_s0, 7 }
  0x3a   : > { %138 = vadd.xlane.f32.xlu0 %v137_v0  ;;  %s256_s30 = sld [smem:[#allocation3 + $0x1]]  ;;  %s136_s4 = scalar_lea.vmem [#allocation7], %s254_s27 }
  0x3b   : > { %s178_s5 = sshll.u32 %s136_s4, 4  ;;  %s176_s8 = scalar_lea.hbm %s584_s2, %s258_s3  ;;  %s179_s5 = int_to_ptr.vmem [resolvable:$true] %s178_s5 }
  0x3c   : > { %s165_s9 = scalar_lea.sflag [#allocation6], %s535_s26  ;;  %s348_s10 = scalar_lea.vmem %s179_s5, 128 }
  0x3d   : > { %p349_p11 = scmp.ne.s32.totalorder %s179_s5, %s348_s10  ;;  %p595_p12 = scmp.ne.s32.totalorder %s589_s23, 0 }
  0x3e   : > { %s418_s11 = smov [#allocation7]  }
  0x3f   : > { %v156_v13 = vstv %s154_s22  ;;  %p350_p13 = pnand %p349_p11, %p595_p12  ;;  %s352_s16 = sshll.u32 %s418_s11, 4  ;;  %s353_s16 = int_to_ptr.vmem [resolvable:$false] %s352_s16 }
  0x40   : > { %v161_v16 = vstv %s256_s30  ;;  %s354_s0 = scalar_lea.vmem %s353_s16, 256  ;;  %p355_p3 = scmp.lt.s32.totalorder %s179_s5, %s353_s16 }
  0x41   : > { %p351_p1 = pneg %p350_p13  ;;  %p356_p5 = scmp.lt.s32.totalorder %s354_s0, %s348_s10 }
  0x43   : > { %p357_p8 = por %p356_p5, %p355_p3 }
  0x45   : > { %p358_p10 = pnand %p357_p8, %p351_p1 }
  0xc3   : > { %v139_v1 = vpop.xlane.xlu0 %138 }
  0xc4   : > { %v141_v2 = vmul.f32 0.0078125, %v139_v1 }
  0xc6   : > { %v142_v3 = vsub.f32 %v137_v0, %v141_v2 }
  0xc8   : > { %v143_v4 = vmul.f32 %v142_v3, %v142_v3 }
  0xca   : > { %144 = vadd.xlane.f32.xlu0 %v143_v4 }
 0x153   : > { %v145_v5 = vpop.xlane.xlu0 %144 }
 0x154   : > { %v146_v6 = vmul.f32 0.007874016, %v145_v5 }
 0x156   : > { %308 = vrsqrt.f32 %v146_v6  ;;  %vm149_vm0 = vcmp.eq.f32.partialorder %v146_v6, inf  ;;  %v152_v9 = vand.u32 2147483648, %v146_v6  ;;  %vm151_vm1 = vcmp.eq.f32.partialorder %v146_v6, 0.0 }
 0x163   : > { %v309_v7 = vpop.eup %308 }
 0x164   : > { %v148_v8 = vmul.f32 %v309_v7, %v146_v6 }
 0x166   : > { %v150_v10 = vsel %vm149_vm0, %v146_v6, %v148_v8 }
 0x167   : > { %v153_v11 = vsel %vm151_vm1, %v152_v9, %v150_v10 }
 0x168   : > { %v155_v12 = vadd.f32 1e-06, %v153_v11 }
 0x16a   : > { %310 = vrcp.f32 %v155_v12 }
 0x177   : > { %v311_v14 = vpop.eup %310 }
 0x178   : > { %v158_v15 = vmul.f32 %v311_v14, %v156_v13 }
 0x17a   : > { %v159_v17 = vmul.f32 %v158_v15, %v142_v3 }
 0x17c   : > { %v162_v18 = vadd.f32 %v161_v16, %v159_v17 }
 0x17e   : > { %163 = vst [vmem:[%s136_s4] sm:$0xff] %v162_v18 }
 0x17f   : > { %361 = shalt.err (!%p358_p10)
}
 0x180   : > { %s362_s18 = scalar_lea.hbm %s176_s8, 128  ;;  %s366_s25 = scalar_lea.hbm %s584_s2, 256 }
 0x181   : > { %p363_p2 = scmp.ne.s32.totalorder %s176_s8, %s362_s18  ;;  %p367_p7 = scmp.lt.s32.totalorder %s176_s8, %s584_s2 }
 0x182   : > { %p368_p0 = scmp.lt.s32.totalorder %s366_s25, %s362_s18 }
 0x183   : > { %p364_p4 = pnand %p363_p2, %p595_p12 }
 0x184   : > { %p369_p6 = por %p368_p0, %p367_p7 }
 0x185   : > { %p365_p9 = pneg %p364_p4 }
 0x187   : > { %p370_p11 = pnand %p369_p6, %p365_p9 }
 0x189   : > { %373 = shalt.err (!%p370_p11)
}
 0x18a   : > { %263 = dma.vmem_to_hbm [thread:$0]  (%p595_p12), %s179_s5, 128, %s176_s8, %s165_s9  }
 0x18b PF: > { %s190_s28 = sand.u32 1, %s402_s12   ;;  %p596_p13 = scmp.ne.s32.totalorder %s590_s24, 0 }
 0x18c   : > { %p597_p1 = scmp.ge.s32.totalorder %s414_s15, 2  ;;  %s191_s29 = scalar_lea.sflag [#allocation6], %s190_s28 }
 0x18e   : > { %p270_p3 = pnand %p597_p1, %p596_p13 }
 0x190   : > { %p271_p5 = pneg %p270_p3 }
 0x192   : > { %397 = dma.done.wait (%p271_p5), %s191_s29, 128  }
 0x193   : > { %399 = vsyncadd (%p271_p5), %s191_s29, 4294967168  ;;  %p19_p8 = scmp.ge.s32.totalorder %s462_s17, 4   ;;  %s598_s12 = smov %s406_s13 }
 0x194   : > { %s599_s13 = smov %s410_s14  ;;  %s600_s14 = smov %s474_s20 }
 0x195   : > { %s601_s15 = smov %s462_s17  ;;  %21 = sbr.rel (!%p19_p8) target bundleno = 10 (0xa), region = 69 }
 0x19a   :  { %196 = vsyncpa [#allocation5], 1 }
 0x19b   :  { %198 = vsyncpa [#allocation5 + $0x1], 1 }
 0x19c   :  { %199 = vsyncpa [#allocation6], 1 }
 0x19d   :  { %201 = vsyncpa [#allocation6 + $0x1], 1 }

</bundles_post_ra>
